<compile_context>
chip_gen: v6e
topology: v6e:2x2x1
jax: 0.10.0
libtpu: 0.0.40
codegen_flags: <defaults>
</compile_context>

<pallas_src>
import functools

import jax
import jax.numpy as jnp
from jax.experimental import pallas as pl
from jax.experimental.pallas import tpu as pltpu

LANES = 128
SUBLANES = 8
MAX_BLOCK_ROWS = 8192                 # 4 MiB f32 per input buffer
VMEM_LIMIT_BYTES = 40 * 1024 * 1024   # headroom on v5e/v6e/v7x


def _combined_loss_kernel(x_ref, t_ref, out_ref, acc_ref, *, alpha, gamma,
                          n_valid, block_rows, blocks_per_split):
    c = pl.program_id(0)          # TensorCore split ("parallel")
    j = pl.program_id(1)          # reduction sweep ("arbitrary", innermost)
    nj = pl.num_programs(1)

    @pl.when(j == 0)
    def _init():
        acc_ref[...] = jnp.zeros_like(acc_ref)

    x = x_ref[...].astype(jnp.float32)
    t = t_ref[...].astype(jnp.float32)

    # Shared transcendental: e = exp(-|x|)
    e = jnp.exp(-jnp.abs(x))

    # Stable BCE-with-logits: max(x, 0) - x*t + log(1 + exp(-|x|))
    bce = jnp.maximum(x, 0.0) - x * t + jnp.log1p(e)

    # 1 - sigmoid(x) = where(x >= 0, e, 1) / (1 + e)  (exact divide keeps 1e-5 tol)
    one_minus_p = jnp.where(x >= 0.0, e, 1.0) / (1.0 + e)

    if float(gamma) == 2.0:
        mod = one_minus_p * one_minus_p
    elif float(gamma) == int(gamma) and int(gamma) >= 0:
        mod = jnp.ones_like(one_minus_p)
        for _ in range(int(gamma)):
            mod = mod * one_minus_p
    else:
        mod = one_minus_p ** gamma

    # Fused: bce + alpha*(1-p)^gamma*bce
    loss = bce * (1.0 + alpha * mod)

    block_elems = block_rows * LANES
    block_idx = c * blocks_per_split + j
    block_start = block_idx * block_elems
    block_end = block_start + block_elems

    # Fast path: block fully in-bounds -> mask-free sublane reduce.
    @pl.when(block_end <= n_valid)
    def _full_block():
        acc_ref[...] += jnp.sum(loss, axis=0, keepdims=True)

    # Tail / overhang / duplicate-clamped block: mask by global element index.
    @pl.when(block_end > n_valid)
    def _tail_block():
        row_ids = jax.lax.broadcasted_iota(jnp.int32, loss.shape, 0)
        lane_ids = jax.lax.broadcasted_iota(jnp.int32, loss.shape, 1)
        gidx = block_start + row_ids * LANES + lane_ids
        masked = jnp.where(gidx < n_valid, loss, 0.0)
        acc_ref[...] += jnp.sum(masked, axis=0, keepdims=True)

    @pl.when(j == nj - 1)
    def _finish():
        out_ref[0] = acc_ref[...]


def combined_loss(inputs, targets, alpha=1.0, gamma=2.0):
    """JAX/Pallas equivalent of CombinedLoss.forward. Returns a float32 scalar."""
    assert inputs.shape == targets.shape
    n_valid = int(inputs.size)
    assert 0 < n_valid < 2**31, "element index math is int32"

    x_flat = inputs.reshape(-1)   # no dtype cast here; kernel upcasts to f32
    t_flat = targets.reshape(-1)

    tile_elems = SUBLANES * LANES
    padded = pl.cdiv(n_valid, tile_elems) * tile_elems
    pad = padded - n_valid
    if pad:
        # TODO(synk): a separate tail block would avoid this full-tensor copy;
        # padded elements are masked out in-kernel so correctness is unaffected.
        x_flat = jnp.pad(x_flat, (0, pad))
        t_flat = jnp.pad(t_flat, (0, pad))

    rows = padded // LANES
    x2 = x_flat.reshape(rows, LANES)
    t2 = t_flat.reshape(rows, LANES)

    block_rows = min(MAX_BLOCK_ROWS, rows)          # multiple of 8, <= rows
    total_blocks = pl.cdiv(rows, block_rows)
    num_splits = 2 if total_blocks >= 2 else 1      # 2 TCs on v7x; no-op elsewhere
    blocks_per_split = pl.cdiv(total_blocks, num_splits)

    def in_idx(c, j):
        # Clamp potential overhang block (odd split); its contribution is masked.
        return (jnp.minimum(c * blocks_per_split + j, total_blocks - 1), 0)

    in_spec = pl.BlockSpec((block_rows, LANES), in_idx)
    out_spec = pl.BlockSpec((1, 1, LANES), lambda c, j: (c, 0, 0))

    kernel = functools.partial(
        _combined_loss_kernel,
        alpha=float(alpha), gamma=float(gamma), n_valid=n_valid,
        block_rows=block_rows, blocks_per_split=blocks_per_split,
    )

    partials = pl.pallas_call(
        kernel,
        out_shape=jax.ShapeDtypeStruct((num_splits, 1, LANES), jnp.float32),
        grid_spec=pltpu.PrefetchScalarGridSpec(
            num_scalar_prefetch=0,
            grid=(num_splits, blocks_per_split),
            in_specs=[in_spec, in_spec],
            out_specs=out_spec,
            scratch_shapes=[pltpu.VMEM((1, LANES), jnp.float32)],
        ),
        compiler_params=pltpu.CompilerParams(
            dimension_semantics=("parallel", "arbitrary"),
            vmem_limit_bytes=VMEM_LIMIT_BYTES,
        ),
    )(x2, t2)

    # mean(bce) + mean(focal) = sum(bce * (1 + alpha*(1-p)^gamma)) / n
    return jnp.sum(partials) / jnp.float32(n_valid)


def _reference(inputs, targets, alpha=1.0, gamma=2.0):
    x = inputs.astype(jnp.float32)
    t = targets.astype(jnp.float32)
    bce_elem = jnp.maximum(x, 0.0) - x * t + jnp.log1p(jnp.exp(-jnp.abs(x)))
    probs = jax.nn.sigmoid(x)
    focal = alpha * (1.0 - probs) ** gamma * bce_elem
    return jnp.mean(bce_elem) + jnp.mean(focal)


if __name__ == "__main__":
    key = jax.random.PRNGKey(0)
    k1, k2 = jax.random.split(key)
    # Segmentation-style logits/targets pair: NCHW
    x = jax.random.normal(k1, (2, 4, 16, 16), dtype=jnp.float32)
    targets = (jax.random.uniform(k2, (2, 4, 16, 16)) > 0.5).astype(jnp.float32)

    loss = combined_loss(x, targets, alpha=1.0, gamma=2.0)
    loss = jax.block_until_ready(loss)

    ref = _reference(x, targets, alpha=1.0, gamma=2.0)
    assert jnp.allclose(loss, ref, rtol=1e-5, atol=1e-5), (loss, ref)
    print("KERNEL_OK")
</pallas_src>

<mosaic_0001>
module attributes {stable_mosaic.version = 11 : i64} {
  func.func @_combined_loss_kernel(%arg0: i32, %arg1: i32, %arg2: memref<16x128xf32, #tpu.memory_space<vmem>>, %arg3: memref<16x128xf32, #tpu.memory_space<vmem>>, %arg4: memref<1x1x128xf32, #tpu.memory_space<vmem>>, %arg5: memref<1x128xf32, #tpu.memory_space<vmem>>) attributes {dimension_semantics = [#tpu.dimension_semantics<parallel>, #tpu.dimension_semantics<arbitrary>], iteration_bounds = array<i64: 1, 1>, scalar_prefetch = 0 : i64, scratch_operands = 1 : i64, tpu.core_type = #tpu.core_type<tc>, window_params = [{transform_indices = @transform_0, window_bounds = array<i64: 16, 128>}, {transform_indices = @transform_1, window_bounds = array<i64: 16, 128>}, {transform_indices = @transform_2, window_bounds = array<i64: 1, 1, 128>}]} {
    %c0_i32 = arith.constant 0 : i32
    %0 = arith.cmpi eq, %arg1, %c0_i32 : i32
    %1 = arith.extui %0 : i1 to i32
    %c0_i32_0 = arith.constant 0 : i32
    %2 = arith.cmpi ne, %1, %c0_i32_0 : i32
    scf.if %2 {
      %cst_17 = arith.constant 0.000000e+00 : f32
      %41 = vector.broadcast %cst_17 : f32 to vector<1x128xf32>
      %c0_18 = arith.constant 0 : index
      %c0_19 = arith.constant 0 : index
      %42 = vector.load %arg5[%c0_18, %c0_19] : memref<1x128xf32, #tpu.memory_space<vmem>>, vector<1x128xf32>
      tpu.vector_store %arg5[%c0_18, %c0_19], %41 {strides = array<i32>} : memref<1x128xf32, #tpu.memory_space<vmem>>, vector<1x128xf32>,
    } else {
    }
    %c0 = arith.constant 0 : index
    %c0_1 = arith.constant 0 : index
    %3 = vector.load %arg2[%c0, %c0_1] : memref<16x128xf32, #tpu.memory_space<vmem>>, vector<16x128xf32>
    %c0_2 = arith.constant 0 : index
    %c0_3 = arith.constant 0 : index
    %4 = vector.load %arg3[%c0_2, %c0_3] : memref<16x128xf32, #tpu.memory_space<vmem>>, vector<16x128xf32>
    %5 = math.absf %3 : vector<16x128xf32>
    %cst = arith.constant 0.000000e+00 : f32
    %6 = vector.broadcast %cst : f32 to vector<16x128xf32>
    %7 = arith.subf %6, %5 : vector<16x128xf32>
    %8 = math.exp %7 : vector<16x128xf32>
    %cst_4 = arith.constant 0.000000e+00 : f32
    %9 = vector.broadcast %cst_4 : f32 to vector<16x128xf32>
    %10 = arith.maximumf %3, %9 : vector<16x128xf32>
    %11 = arith.mulf %3, %4 : vector<16x128xf32>
    %12 = arith.subf %10, %11 : vector<16x128xf32>
    %13 = math.log1p %8 : vector<16x128xf32>
    %14 = arith.addf %12, %13 : vector<16x128xf32>
    %cst_5 = arith.constant 0.000000e+00 : f32
    %15 = vector.broadcast %cst_5 : f32 to vector<16x128xf32>
    %16 = arith.cmpf oge, %3, %15 : vector<16x128xf32>
    %cst_6 = arith.constant 1.000000e+00 : f32
    %17 = vector.broadcast %cst_6 : f32 to vector<16x128xf32>
    %18 = arith.select %16, %8, %17 : vector<16x128xi1>, vector<16x128xf32>
    %cst_7 = arith.constant 1.000000e+00 : f32
    %19 = vector.broadcast %cst_7 : f32 to vector<16x128xf32>
    %20 = arith.addf %19, %8 : vector<16x128xf32>
    %21 = arith.divf %18, %20 : vector<16x128xf32>
    %22 = arith.mulf %21, %21 : vector<16x128xf32>
    %cst_8 = arith.constant 1.000000e+00 : f32
    %23 = vector.broadcast %cst_8 : f32 to vector<16x128xf32>
    %24 = arith.mulf %23, %22 : vector<16x128xf32>
    %cst_9 = arith.constant 1.000000e+00 : f32
    %25 = vector.broadcast %cst_9 : f32 to vector<16x128xf32>
    %26 = arith.addf %25, %24 : vector<16x128xf32>
    %27 = arith.mulf %14, %26 : vector<16x128xf32>
    %c1_i32 = arith.constant 1 : i32
    %28 = arith.muli %arg0, %c1_i32 : i32
    %29 = arith.addi %28, %arg1 : i32
    %c2048_i32 = arith.constant 2048 : i32
    %30 = arith.muli %29, %c2048_i32 : i32
    %c2048_i32_10 = arith.constant 2048 : i32
    %31 = arith.addi %30, %c2048_i32_10 : i32
    %c2048_i32_11 = arith.constant 2048 : i32
    %32 = arith.cmpi sle, %31, %c2048_i32_11 : i32
    %33 = arith.extui %32 : i1 to i32
    %c0_i32_12 = arith.constant 0 : i32
    %34 = arith.cmpi ne, %33, %c0_i32_12 : i32
    scf.if %34 {
      %c0_17 = arith.constant 0 : index
      %c0_18 = arith.constant 0 : index
      %41 = vector.load %arg5[%c0_17, %c0_18] : memref<1x128xf32, #tpu.memory_space<vmem>>, vector<1x128xf32>
      %cst_19 = arith.constant dense<0.000000e+00> : vector<128xf32>
      %42 = vector.multi_reduction <add>, %27, %cst_19 [0] : vector<16x128xf32> to vector<128xf32>
      %43 = vector.shape_cast %42 : vector<128xf32> to vector<1x128xf32>
      %44 = arith.addf %41, %43 : vector<1x128xf32>
      %c0_20 = arith.constant 0 : index
      %c0_21 = arith.constant 0 : index
      %45 = vector.load %arg5[%c0_20, %c0_21] : memref<1x128xf32, #tpu.memory_space<vmem>>, vector<1x128xf32>
      tpu.vector_store %arg5[%c0_20, %c0_21], %44 {strides = array<i32>} : memref<1x128xf32, #tpu.memory_space<vmem>>, vector<1x128xf32>,
    } else {
    }
    %c2048_i32_13 = arith.constant 2048 : i32
    %35 = arith.cmpi sgt, %31, %c2048_i32_13 : i32
    %36 = arith.extui %35 : i1 to i32
    %c0_i32_14 = arith.constant 0 : i32
    %37 = arith.cmpi ne, %36, %c0_i32_14 : i32
    scf.if %37 {
      %41 = tpu.iota {dimensions = array<i32: 0>} : vector<16x128xi32>
      %42 = tpu.iota {dimensions = array<i32: 1>} : vector<16x128xi32>
      %c128_i32 = arith.constant 128 : i32
      %43 = vector.broadcast %c128_i32 : i32 to vector<16x128xi32>
      %44 = arith.muli %41, %43 : vector<16x128xi32>
      %45 = vector.broadcast %30 : i32 to vector<16x128xi32>
      %46 = arith.addi %45, %44 : vector<16x128xi32>
      %47 = arith.addi %46, %42 : vector<16x128xi32>
      %c2048_i32_17 = arith.constant 2048 : i32
      %48 = vector.broadcast %c2048_i32_17 : i32 to vector<16x128xi32>
      %49 = arith.cmpi slt, %47, %48 : vector<16x128xi32>
      %cst_18 = arith.constant 0.000000e+00 : f32
      %50 = vector.broadcast %cst_18 : f32 to vector<16x128xf32>
      %51 = arith.select %49, %27, %50 : vector<16x128xi1>, vector<16x128xf32>
      %c0_19 = arith.constant 0 : index
      %c0_20 = arith.constant 0 : index
      %52 = vector.load %arg5[%c0_19, %c0_20] : memref<1x128xf32, #tpu.memory_space<vmem>>, vector<1x128xf32>
      %cst_21 = arith.constant dense<0.000000e+00> : vector<128xf32>
      %53 = vector.multi_reduction <add>, %51, %cst_21 [0] : vector<16x128xf32> to vector<128xf32>
      %54 = vector.shape_cast %53 : vector<128xf32> to vector<1x128xf32>
      %55 = arith.addf %52, %54 : vector<1x128xf32>
      %c0_22 = arith.constant 0 : index
      %c0_23 = arith.constant 0 : index
      %56 = vector.load %arg5[%c0_22, %c0_23] : memref<1x128xf32, #tpu.memory_space<vmem>>, vector<1x128xf32>
      tpu.vector_store %arg5[%c0_22, %c0_23], %55 {strides = array<i32>} : memref<1x128xf32, #tpu.memory_space<vmem>>, vector<1x128xf32>,
    } else {
    }
    %c0_i32_15 = arith.constant 0 : i32
    %38 = arith.cmpi eq, %arg1, %c0_i32_15 : i32
    %39 = arith.extui %38 : i1 to i32
    %c0_i32_16 = arith.constant 0 : i32
    %40 = arith.cmpi ne, %39, %c0_i32_16 : i32
    scf.if %40 {
      %c0_17 = arith.constant 0 : index
      %c0_18 = arith.constant 0 : index
      %41 = vector.load %arg5[%c0_17, %c0_18] : memref<1x128xf32, #tpu.memory_space<vmem>>, vector<1x128xf32>
      %c0_19 = arith.constant 0 : index
      %c0_20 = arith.constant 0 : index
      %c0_21 = arith.constant 0 : index
      %42 = vector.load %arg4[%c0_19, %c0_20, %c0_21] : memref<1x1x128xf32, #tpu.memory_space<vmem>>, vector<1x1x128xf32>
      %43 = vector.shape_cast %42 : vector<1x1x128xf32> to vector<1x128xf32>
      %44 = vector.shape_cast %41 : vector<1x128xf32> to vector<1x1x128xf32>
      tpu.vector_store %arg4[%c0_19, %c0_20, %c0_21], %44 {strides = array<i32>} : memref<1x1x128xf32, #tpu.memory_space<vmem>>, vector<1x1x128xf32>,
    } else {
    }
    return
  }
  func.func @transform_0(%arg0: i32, %arg1: i32) -> (i32, i32) {
    %c1_i32 = arith.constant 1 : i32
    %0 = arith.muli %arg0, %c1_i32 : i32
    %1 = arith.addi %0, %arg1 : i32
    %c0_i32 = arith.constant 0 : i32
    %2 = arith.minsi %1, %c0_i32 : i32
    %c0_i32_0 = arith.constant 0 : i32
    %c0_i32_1 = arith.constant 0 : i32
    return %2, %c0_i32_0 : i32, i32
  }
  func.func @transform_1(%arg0: i32, %arg1: i32) -> (i32, i32) {
    %c1_i32 = arith.constant 1 : i32
    %0 = arith.muli %arg0, %c1_i32 : i32
    %1 = arith.addi %0, %arg1 : i32
    %c0_i32 = arith.constant 0 : i32
    %2 = arith.minsi %1, %c0_i32 : i32
    %c0_i32_0 = arith.constant 0 : i32
    %c0_i32_1 = arith.constant 0 : i32
    return %2, %c0_i32_0 : i32, i32
  }
  func.func @transform_2(%arg0: i32, %arg1: i32) -> (i32, i32, i32) {
    %c0_i32 = arith.constant 0 : i32
    %c0_i32_0 = arith.constant 0 : i32
    %c0_i32_1 = arith.constant 0 : i32
    return %arg0, %c0_i32, %c0_i32_0 : i32, i32, i32
  }
}

</mosaic_0001>

<bundles_post_ra>
// kernel: tpu_custom_call.1
= control target key start
LH: loop header
LB: loop body
LE: loop exit
PB: predicated region body
PF: predicated region fallthrough
CT: control target
= control target key end

     0   :  { %7 = vsyncpa [#allocation4], 0  ;;  %s311_s0 = inlined_call_operand.hbm [shape: f32[16,128], index: 0, kind: input, shape index: {}]   ;;  %s312_s1 = inlined_call_operand.hbm [shape: f32[16,128], index: 1, kind: input, shape index: {}]   ;;  %s313_s2 = inlined_call_operand.hbm [shape: f32[1,1,128], index: 2, kind: output, shape index: {}]  }
   0x1   :  { %8 = vsyncpa [#allocation7], 0 }
   0x2   :  { %9 = vsyncpa [#allocation5], 0  ;;  %s275_s9 = smov [#allocation3]  }
   0x3   :  { %s21_s10 = sshll.u32 %s275_s9, 4  ;;  %s22_s10 = int_to_ptr.vmem [resolvable:$true] %s21_s10 }
   0x4   :  { %s217_s11 = scalar_lea.vmem %s22_s10, 256  ;;  %p222_p1 = scmp.lt.s32.totalorder %s22_s10, %s22_s10 }
   0x5   :  { %p218_p0 = scmp.ne.s32.totalorder %s22_s10, %s217_s11  ;;  %p223_p2 = scmp.lt.s32.totalorder %s217_s11, %s217_s11 }
   0x7   :  { %p224_p3 = por %p223_p2, %p222_p1 }
   0x9   :  { %p225_p4 = pnand %p224_p3, %p218_p0 }
   0xb   :  { %228 = shalt.err (!%p225_p4)
}
   0xc   :  { %s276_s12 = smov 128   ;;  %s277_s13 = smov 8  }
   0xd   :  { %27 = dma.hbm_to_vmem [thread:$0]  %s311_s0, 256, %s22_s10, [#allocation4], %s276_s12, %s276_s12, %s277_s13  }
   0xe   :  { %s278_s16 = smov [#allocation6]  }
   0xf   :  { %s39_s17 = sshll.u32 %s278_s16, 4  ;;  %s40_s17 = int_to_ptr.vmem [resolvable:$true] %s39_s17 }
  0x10   :  { %s237_s18 = scalar_lea.vmem %s40_s17, 256  ;;  %p242_p6 = scmp.lt.s32.totalorder %s40_s17, %s40_s17 }
  0x11   :  { %p238_p5 = scmp.ne.s32.totalorder %s40_s17, %s237_s18  ;;  %p243_p7 = scmp.lt.s32.totalorder %s237_s18, %s237_s18 }
  0x13   :  { %p244_p8 = por %p243_p7, %p242_p6 }
  0x15   :  { %p245_p9 = pnand %p244_p8, %p238_p5 }
  0x17   :  { %248 = shalt.err (!%p245_p9)
}
  0x18   :  { %45 = dma.hbm_to_vmem [thread:$0]  %s312_s1, 256, %s40_s17, [#allocation7], %s276_s12, %s276_s12, %s277_s13  }
  0x19   :  { %269 = dma.done.wait [#allocation4], 256  }
  0x1a   :  { %270 = vsyncadd [#allocation4], 4294967040 }
  0x1b   :  { %271 = dma.done.wait [#allocation7], 256  }
  0x1c   :  { %272 = vsyncadd [#allocation7], 4294967040  ;;  %v279_v0 = vmov 0.0   ;;  %v65_v1 = vld [vmem:[#allocation3] sm:$0xff]  ;;  %v66_v2 = vld [vmem:[#allocation3 + $0x8] sm:$0xff]  ;;  %s280_s0 = smov [#allocation8]  }
  0x1d   :  { %64 = vst [vmem:[#allocation2] sm:$0x1] %v279_v0  ;;  %v69_v3 = vand.u32 2147483647, %v65_v1  ;;  %v70_v4 = vand.u32 2147483647, %v66_v2 }
  0x1e   :  { %v67_v15 = vld [vmem:[#allocation6] sm:$0xff]  ;;  %v68_v16 = vld [vmem:[#allocation6 + $0x8] sm:$0xff]  ;;  %v77_v20 = vmax.f32 %v65_v1, 0.0  ;;  %vm103_vm0 = vcmp.ge.f32.partialorder %v65_v1, 0.0  ;;  %v78_v23 = vmax.f32 %v66_v2, 0.0  ;;  %vm104_vm1 = vcmp.ge.f32.partialorder %v66_v2, 0.0 }
  0x1f   :  { %v71_v5 = vsub.f32 0.0, %v69_v3  ;;  %v72_v6 = vsub.f32 0.0, %v70_v4  ;;  %v79_v21 = vmul.f32 %v67_v15, %v65_v1  ;;  %v80_v24 = vmul.f32 %v68_v16, %v66_v2  ;;  %s177_s1 = sshll.u32 %s280_s0, 4  ;;  %s178_s1 = int_to_ptr.vmem [resolvable:$true] %s177_s1 }
  0x20   :  { %s249_s21 = scalar_lea.vmem %s178_s1, 16  ;;  %s253_s22 = scalar_lea.vmem %s178_s1, 32 }
  0x21   :  { %v73_v7 = vmul.f32 1.442695, %v71_v5  ;;  %v75_v8 = vmul.f32 1.442695, %v72_v6  ;;  %v81_v31 = vsub.f32 %v77_v20, %v79_v21  ;;  %v82_v35 = vsub.f32 %v78_v23, %v80_v24  ;;  %p250_p10 = scmp.ne.s32.totalorder %s178_s1, %s249_s21  ;;  %p254_p11 = scmp.lt.s32.totalorder %s178_s1, %s178_s1 }
  0x22   :  { %p255_p12 = scmp.lt.s32.totalorder %s253_s22, %s249_s21 }
  0x23   :  { %197 = vpow2.f32 %v73_v7 }
  0x24   :  { %199 = vpow2.f32 %v75_v8  ;;  %v126_v56 = vld [vmem:[#allocation2] sm:$0x1]  ;;  %p256_p13 = por %p255_p12, %p254_p11 }
  0x26   :  { %p257_p0 = pnand %p256_p13, %p250_p10 }
  0x30   :  { %v198_v9 = vpop.eup %197 }
  0x31   :  { %v200_v10 = vpop.eup %199  ;;  %v83_v11 = vadd.f32 1.0, %v198_v9  ;;  %v86_v13 = vmul.f32 -0.5, %v198_v9  ;;  %v89_v18 = vand.u32 2147483647, %v198_v9  ;;  %v105_v29 = vsel %vm103_vm0, %v198_v9, 1.0 }
  0x32   :  { %v92_v12 = vadd.f32 1.0, %v200_v10  ;;  %v95_v14 = vmul.f32 -0.5, %v200_v10  ;;  %v98_v22 = vand.u32 2147483647, %v200_v10  ;;  %v106_v33 = vsel %vm104_vm1, %v200_v10, 1.0 }
  0x33   :  { %201 = vlog2.f32 %v83_v11  ;;  %v87_v17 = vadd.f32 1.0, %v86_v13  ;;  %vm302_vm2 = vcmp.lt.f32.partialorder %v89_v18, 0.0004427343 }
  0x34   :  { %203 = vlog2.f32 %v92_v12  ;;  %v96_v19 = vadd.f32 1.0, %v95_v14  ;;  %vm99_vm3 = vcmp.lt.f32.partialorder %v98_v22, 0.0004427343 }
  0x35   :  { %205 = vrcp.f32 %v83_v11  ;;  %v88_v25 = vmul.f32 %v198_v9, %v87_v17 }
  0x36   :  { %207 = vrcp.f32 %v92_v12  ;;  %v97_v28 = vmul.f32 %v200_v10, %v96_v19 }
  0x40   :  { %v202_v26 = vpop.eup %201 }
  0x41   :  { %v204_v30 = vpop.eup %203  ;;  %v85_v32 = vmul.f32 0.6931472, %v202_v26 }
  0x42   :  { %v206_v34 = vpop.eup %205  ;;  %v94_v36 = vmul.f32 0.6931472, %v204_v30 }
  0x43   :  { %v208_v37 = vpop.eup %207  ;;  %v91_v38 = vsel %vm302_vm2, %v88_v25, %v85_v32  ;;  %v110_v39 = vmul.f32 %v206_v34, %v105_v29 }
  0x44   :  { %v100_v40 = vsel %vm99_vm3, %v97_v28, %v94_v36  ;;  %v112_v41 = vmul.f32 %v208_v37, %v106_v33  ;;  %v101_v42 = vadd.f32 %v91_v38, %v81_v31 }
  0x45   :  { %v113_v43 = vmul.f32 %v110_v39, %v110_v39  ;;  %v102_v44 = vadd.f32 %v100_v40, %v82_v35 }
  0x46   :  { %v114_v45 = vmul.f32 %v112_v41, %v112_v41 }
  0x47   :  { %v115_v46 = vadd.f32 1.0, %v113_v43 }
  0x48   :  { %v116_v47 = vadd.f32 1.0, %v114_v45 }
  0x49   :  { %v117_v48 = vmul.f32 %v115_v46, %v101_v42 }
  0x4a   :  { %v118_v49 = vmul.f32 %v116_v47, %v102_v44 }
  0x4c   :  { %v127_v50 = vadd.f32 %v118_v49, %v117_v48 }
  0x4e   :  { %v128_v51 = vrot.slane %v127_v50, 4 }
  0x50   :  { %v129_v52 = vadd.f32 %v128_v51, %v127_v50 }
  0x52   :  { %v130_v53 = vrot.slane %v129_v52, 2 }
  0x54   :  { %v131_v54 = vadd.f32 %v130_v53, %v129_v52 }
  0x56   :  { %v132_v55 = vrot.slane %v131_v54, 1 }
  0x58   :  { %v133_v57 = vadd.f32 %v132_v55, %v131_v54 }
  0x5a   :  { %v134_v58 = vadd.f32 %v133_v57, %v126_v56 }
  0x5c   :  { %135 = vst [vmem:[#allocation2] sm:$0x1] %v134_v58 }
  0x63   :  { %v169_v59 = vld [vmem:[#allocation2] sm:$0x1] }
  0x64   :  { %170 = vst [vmem:[#allocation8] sm:$0x1] %v169_v59 }
  0x65   :  { %260 = shalt.err (!%p257_p0)
}
  0x66   :  { %180 = dma.vmem_to_hbm [thread:$0]  %s178_s1, 16, %s313_s2, [#allocation5]  }
  0x67   :  { %273 = dma.done.wait [#allocation5], 16  }
  0x68   :  { %274 = vsyncadd [#allocation5], 4294967280 }
  0x69   :  { %184 = vsyncpa [#allocation4], 1 }
  0x6a   :  { %185 = vsyncpa [#allocation7], 1 }
  0x6b   :  { %186 = vsyncpa [#allocation5], 1 }

</bundles_post_ra>
